<compile_context>
chip_gen: v6e
topology: v6e:2x2x1
jax: 0.10.0
libtpu: 0.0.40
codegen_flags: <defaults>
</compile_context>

<pallas_src>
import functools
import numpy as np

import jax
import jax.numpy as jnp
from jax import lax
from jax.experimental import pallas as pl
from jax.experimental.pallas import tpu as pltpu


_EPS = 1e-5
# Flip to feed bf16 into the MXU (accumulation stays f32).  Off by default so
# numerics match the f32 PyTorch reference.
USE_BF16_MXU = False
_VMEM_LIMIT = 48 * 1024 * 1024


def _round_up(x, m):
    return (x + m - 1) // m * m


def _sigmoid(x):
    return 1.0 / (1.0 + jnp.exp(-x))


# ----------------------------------------------------------------------------
# Pallas kernels
# ----------------------------------------------------------------------------
def _mm_kernel(x_ref, w_ref, b_ref, o_ref, *, relu):
    acc = jnp.dot(x_ref[...], w_ref[...], preferred_element_type=jnp.float32)
    acc = acc + b_ref[...]
    if relu:
        acc = jnp.maximum(acc, 0.0)
    o_ref[...] = acc.astype(o_ref.dtype)


def matmul_bias(x, w, b, relu=False, tm=512):
    """out = relu?(x @ w + b); x:(M,K) w:(K,N) b:(N,) -> (M,N) f32.

    M is tiled (double-buffered, megacore-parallel).  K/N stay whole blocks:
    at these sizes a single K block is correct & fast; if K were tiled a VMEM
    accumulator with pl.when init/finalize (K axis last, "arbitrary") would be
    required.
    """
    x = jnp.asarray(x, jnp.float32)
    w = jnp.asarray(w, jnp.float32)
    M, K = x.shape
    K2, N = w.shape
    assert K == K2
    b2 = jnp.asarray(b, jnp.float32).reshape(1, N)

    if USE_BF16_MXU:
        x = x.astype(jnp.bfloat16)
        w = w.astype(jnp.bfloat16)

    # VMEM budget: double-buffered x-tile + out-tile stays under ~24 MiB
    # (safe for v7x's smaller VMEM).
    in_bytes = 2 if USE_BF16_MXU else 4
    cap = (24 * 1024 * 1024) // (2 * (K * in_bytes + N * 4))
    tm_cap = max(8, (cap // 8) * 8)
    TM = min(tm, tm_cap, _round_up(M, 8))
    Mp = _round_up(M, TM)
    if Mp != M:
        x = jnp.pad(x, ((0, Mp - M), (0, 0)))

    out = pl.pallas_call(
        functools.partial(_mm_kernel, relu=relu),
        grid=(Mp // TM,),
        in_specs=[
            pl.BlockSpec((TM, K), lambda i: (i, 0)),
            pl.BlockSpec((K, N), lambda i: (0, 0)),
            pl.BlockSpec((1, N), lambda i: (0, 0)),
        ],
        out_specs=pl.BlockSpec((TM, N), lambda i: (i, 0)),
        out_shape=jax.ShapeDtypeStruct((Mp, N), jnp.float32),
        compiler_params=pltpu.CompilerParams(
            dimension_semantics=("parallel",),
            vmem_limit_bytes=_VMEM_LIMIT),
    )(x, w, b2)
    return out[:M] if Mp != M else out


def _conv_fma_kernel(xp_ref, w_ref, b_ref, o_ref, *, k, H, W, Cin):
    """Direct 2-D conv (stride 1) as k*k*Cin shifted VPU FMAs, BN/ReLU fused."""
    xp = xp_ref[...]                       # (N, H+2p, W+2p, Cin)
    w = w_ref[...]                         # (k*k*Cin, Cout)
    acc = jnp.zeros(o_ref.shape, jnp.float32)
    for di in range(k):
        for dj in range(k):
            for ci in range(Cin):
                row = (di * k + dj) * Cin + ci
                tap = xp[:, di:di + H, dj:dj + W, ci:ci + 1]   # (N,H,W,1)
                acc = acc + tap * w[row:row + 1, :]            # bcast (1,Cout)
    acc = acc + b_ref[...]                 # (1, Cout) broadcasts
    o_ref[...] = jnp.maximum(acc, 0.0)


def _window_sum_kernel(xp_ref, o_ref, *, K, T, scale):
    """Sliding-window sum along the (sublane) time axis; lanes stay dense."""
    acc = xp_ref[0:T, :]
    for j in range(1, K):
        acc = acc + xp_ref[j:j + T, :]
    o_ref[...] = acc * scale


def _dwconv_kernel(xp_ref, w_ref, b_ref, o_ref, *, K, T):
    """Depthwise 1-D conv; time on sublanes, (batch*channel) on lanes."""
    acc = xp_ref[0:T, :] * w_ref[0:1, :]
    for j in range(1, K):
        acc = acc + xp_ref[j:j + T, :] * w_ref[j:j + 1, :]
    o_ref[...] = acc + b_ref[...]


def _bilstm_kernel(gx_ref, whh_ref, out_ref, h_ref, c_ref, *, T, H):
    """Fused bidirectional LSTM recurrence.

    gx_ref : (T, B, 8H) precomputed input gates, column layout
             [i_f,i_b,f_f,f_b,g_f,g_b,o_f,o_b] (fw on x, bw on reversed x).
    whh_ref: (2H, 8H) block-diagonal-per-gate hh weights (VMEM resident).
    out_ref: (T, B, 2H) hidden states [h_f | h_b].
    """
    h_ref[...] = jnp.zeros_like(h_ref)
    c_ref[...] = jnp.zeros_like(c_ref)
    H2 = 2 * H

    def step(t, carry):
        gates = gx_ref[t] + jnp.dot(h_ref[...], whh_ref[...],
                                    preferred_element_type=jnp.float32)
        i = _sigmoid(gates[:, 0 * H2:1 * H2])
        f = _sigmoid(gates[:, 1 * H2:2 * H2])
        g = jnp.tanh(gates[:, 2 * H2:3 * H2])
        o = _sigmoid(gates[:, 3 * H2:4 * H2])
        c_new = f * c_ref[...] + i * g
        h_new = o * jnp.tanh(c_new)
        c_ref[...] = c_new
        h_ref[...] = h_new
        out_ref[t] = h_new
        return carry

    lax.fori_loop(0, T, step, 0, unroll=True)


# ----------------------------------------------------------------------------
# Layer wrappers (layout plumbing + Pallas calls)
# ----------------------------------------------------------------------------
def conv2d_bn_relu_nhwc(x, cp):
    """Conv2d(k, stride, padding=k//2) + BatchNorm2d(eval) + ReLU.  x:(N,H,W,Cin)."""
    w, bias, stride = cp['w'], cp['b'], cp['stride']
    Cout, Cin, k, _ = w.shape
    s = cp['gamma'] / jnp.sqrt(cp['rv'] + _EPS)
    t = cp['beta'] - cp['rm'] * s
    w2 = (w * s[:, None, None, None]).transpose(2, 3, 1, 0).reshape(k * k * Cin, Cout)
    b2 = (bias * s + t).reshape(1, Cout)

    N, H, W, _ = x.shape
    p = k // 2
    xp = jnp.pad(jnp.asarray(x, jnp.float32), ((0, 0), (p, p), (p, p), (0, 0)))

    if stride == 1 and k % 2 == 1:
        Hp, Wp = H + 2 * p, W + 2 * p
        return pl.pallas_call(
            functools.partial(_conv_fma_kernel, k=k, H=H, W=W, Cin=Cin),
            grid=(1,),
            in_specs=[
                pl.BlockSpec((N, Hp, Wp, Cin), lambda i: (0, 0, 0, 0)),
                pl.BlockSpec((k * k * Cin, Cout), lambda i: (0, 0)),
                pl.BlockSpec((1, Cout), lambda i: (0, 0)),
            ],
            out_specs=pl.BlockSpec((N, H, W, Cout), lambda i: (0, 0, 0, 0)),
            out_shape=jax.ShapeDtypeStruct((N, H, W, Cout), jnp.float32),
        )(xp, w2, b2)

    # TODO(synk): strided / even-kernel conv falls back to wrapper-side im2col
    # feeding the tiled Pallas matmul (not hit by the default configs).
    Ho = (H + 2 * p - k) // stride + 1
    Wo = (W + 2 * p - k) // stride + 1
    cols = [xp[:, di:di + stride * (Ho - 1) + 1:stride,
               dj:dj + stride * (Wo - 1) + 1:stride, :]
            for di in range(k) for dj in range(k)]
    patches = jnp.concatenate(cols, axis=-1).reshape(N * Ho * Wo, k * k * Cin)
    y = matmul_bias(patches, w2, b2.reshape(-1), relu=True)
    return y.reshape(N, Ho, Wo, Cout)


def avg_pool1d(x, K):
    """AvgPool1d(K, stride=1, padding=K//2, count_include_pad=True).  x:(N,F,T)."""
    # Even K would change the output length (and break the original model's
    # concat as well); assert early instead of silently mis-shaping.
    assert K % 2 == 1, "avg_pool1d: even kernel sizes are not supported"
    N, F, T = x.shape
    p = K // 2
    L = N * F
    xt = jnp.asarray(x, jnp.float32).transpose(2, 0, 1).reshape(T, L)
    Tp = _round_up(T + 2 * p, 8)
    xp = jnp.pad(xt, ((p, Tp - T - p), (0, 0)))
    out = pl.pallas_call(
        functools.partial(_window_sum_kernel, K=K, T=T, scale=1.0 / K),
        grid=(1,),
        in_specs=[pl.BlockSpec((Tp, L), lambda i: (0, 0))],
        out_specs=pl.BlockSpec((T, L), lambda i: (0, 0)),
        out_shape=jax.ShapeDtypeStruct((T, L), jnp.float32),
    )(xp)
    return out.reshape(T, N, F).transpose(1, 2, 0)


def depthwise_conv1d(x, w, b):
    """Grouped Conv1d(C, C, K, stride=1, pad=K//2, groups=C).  x:(N,T,C)->(N,T,C)."""
    N, T, C = x.shape
    K = w.shape[1]
    p = K // 2
    L = N * C
    xt = jnp.asarray(x, jnp.float32).transpose(1, 0, 2).reshape(T, L)
    Tp = _round_up(T + 2 * p, 8)
    xp = jnp.pad(xt, ((p, Tp - T - p), (0, 0)))
    w_t = jnp.tile(jnp.asarray(w, jnp.float32).T, (1, N))          # (K, N*C)
    b_t = jnp.tile(jnp.asarray(b, jnp.float32), (N,)).reshape(1, L)
    out = pl.pallas_call(
        functools.partial(_dwconv_kernel, K=K, T=T),
        grid=(1,),
        in_specs=[pl.BlockSpec((Tp, L), lambda i: (0, 0)),
                  pl.BlockSpec((K, L), lambda i: (0, 0)),
                  pl.BlockSpec((1, L), lambda i: (0, 0))],
        out_specs=pl.BlockSpec((T, L), lambda i: (0, 0)),
        out_shape=jax.ShapeDtypeStruct((T, L), jnp.float32),
    )(xp, w_t, b_t)
    return out.reshape(T, N, C).transpose(1, 0, 2)


def _pack_gate_cols(wf_t, wb_t, H):
    """Per-gate block-diagonal packing of fw/bw weights.

    wf_t:(Df,4H), wb_t:(Db,4H) with column blocks [i,f,g,o] (PyTorch order).
    Returns (Df+Db, 8H) with columns [i_f,i_b,f_f,f_b,g_f,g_b,o_f,o_b].
    """
    Df, Db = wf_t.shape[0], wb_t.shape[0]
    top = jnp.concatenate(
        [wf_t.reshape(Df, 4, 1, H), jnp.zeros((Df, 4, 1, H), jnp.float32)], axis=2)
    bot = jnp.concatenate(
        [jnp.zeros((Db, 4, 1, H), jnp.float32), wb_t.reshape(Db, 4, 1, H)], axis=2)
    return jnp.concatenate([top, bot], axis=0).reshape(Df + Db, 8 * H)


def _pack_gate_bias(bf, bb, H):
    return jnp.concatenate(
        [bf.reshape(4, 1, H), bb.reshape(4, 1, H)], axis=1).reshape(8 * H)


def _bilstm_pallas(gx, whh, T, B2, H):
    return pl.pallas_call(
        functools.partial(_bilstm_kernel, T=T, H=H),
        grid=(1,),
        in_specs=[pl.BlockSpec((T, B2, 8 * H), lambda i: (0, 0, 0)),
                  pl.BlockSpec((2 * H, 8 * H), lambda i: (0, 0))],
        out_specs=pl.BlockSpec((T, B2, 2 * H), lambda i: (0, 0, 0)),
        out_shape=jax.ShapeDtypeStruct((T, B2, 2 * H), jnp.float32),
        scratch_shapes=[pltpu.VMEM((B2, 2 * H), jnp.float32),
                        pltpu.VMEM((B2, 2 * H), jnp.float32)],
        compiler_params=pltpu.CompilerParams(vmem_limit_bytes=_VMEM_LIMIT),
    )(gx, whh)


def lstm_projection(x, lengths, p):
    """LSTM_Projection: packed BiLSTM + per-direction Linear + ReLU + concat."""
    B2, T, D = x.shape
    H = p['Whh_f'].shape[1]
    L = p['Wproj_f'].shape[0]

    lens = jnp.asarray(np.asarray(lengths, np.int32))
    tt = jnp.arange(T, dtype=jnp.int32)
    mask = (tt[None, :] < lens[:, None]).astype(jnp.float32)        # (B2, T)
    rev_idx = jnp.clip(lens[:, None] - 1 - tt[None, :], 0, T - 1)   # (B2, T)
    x_rev = jnp.take_along_axis(
        x, jnp.broadcast_to(rev_idx[..., None], x.shape), axis=1)

    # fused fw/bw input projection (one matmul instead of two)
    wx = _pack_gate_cols(p['Wih_f'].T, p['Wih_b'].T, H)             # (2D, 8H)
    bx = _pack_gate_bias(p['bih_f'] + p['bhh_f'], p['bih_b'] + p['bhh_b'], H)
    xcat = jnp.concatenate([x, x_rev], axis=-1).reshape(B2 * T, 2 * D)
    gx = matmul_bias(xcat, wx, bx).reshape(B2, T, 8 * H).transpose(1, 0, 2)

    # both recurrent directions in a single Pallas kernel (weights VMEM-resident)
    whh = _pack_gate_cols(p['Whh_f'].T, p['Whh_b'].T, H)            # (2H, 8H)
    hout = _bilstm_pallas(gx, whh, T, B2, H).transpose(1, 0, 2)     # (B2, T, 2H)

    # pack/pad_packed semantics: zero hidden states beyond each length
    h_f = hout[..., :H] * mask[..., None]
    h_b = jnp.take_along_axis(
        hout[..., H:], jnp.broadcast_to(rev_idx[..., None], (B2, T, H)), axis=1)
    h_b = h_b * mask[..., None]

    # fused fw/bw output projection (block-diagonal weight) + ReLU
    wp = jnp.zeros((2 * H, 2 * L), jnp.float32)
    wp = wp.at[:H, :L].set(p['Wproj_f'].T).at[H:, L:].set(p['Wproj_b'].T)
    bp = jnp.concatenate([p['bproj_f'], p['bproj_b']])
    hcat = jnp.concatenate([h_f, h_b], axis=-1).reshape(B2 * T, 2 * H)
    return matmul_bias(hcat, wp, bp, relu=True).reshape(B2, T, 2 * L)


# ----------------------------------------------------------------------------
# Parameter initialization (deterministic, synthetic)
# ----------------------------------------------------------------------------
def init_params(key, configs):
    keys = iter(jax.random.split(key, 256))

    def nrm(shape, scale=0.1):
        return scale * jax.random.normal(next(keys), shape, jnp.float32)

    def bn(c):
        return dict(gamma=1.0 + nrm((c,)), beta=nrm((c,)),
                    rm=nrm((c,)), rv=1.0 + jnp.abs(nrm((c,))))

    def lstm_proj(D, H, L):
        p = {}
        for d in ('f', 'b'):
            p['Wih_' + d] = nrm((4 * H, D))
            p['Whh_' + d] = nrm((4 * H, H))
            p['bih_' + d] = nrm((4 * H,))
            p['bhh_' + d] = nrm((4 * H,))
        p['Wproj_f'] = nrm((L, H)); p['bproj_f'] = nrm((L,))
        p['Wproj_b'] = nrm((L, H)); p['bproj_b'] = nrm((L,))
        return p

    F = configs['input_dim']
    params = {}
    params['idct'] = nrm((F, F), scale=0.3)          # synthetic idct.npy matrix
    params['batchnorm'] = bn(1)

    params['conv2d_sd'] = []
    for (cin, cout, k, st) in configs['cnn_configs']:
        params['conv2d_sd'].append(
            dict(w=nrm((cout, cin, k, k)), b=nrm((cout,)), stride=st, **bn(cout)))

    params['Linear'] = dict(w=nrm((configs['Linear_dim'], configs['splice_size'])),
                            b=nrm((configs['Linear_dim'],)))

    params['blstmp1'] = lstm_proj(configs['Linear_dim'],
                                  configs['Shared_BLSTM_dim'],
                                  configs['Linear_Shared_layer1_dim'])
    params['blstmp2'] = lstm_proj(configs['Linear_Shared_layer1_dim'] * 2,
                                  configs['Shared_BLSTM_dim'],
                                  configs['Linear_Shared_layer2_dim'])

    cin, cout, k, st = configs['cnn_attention']
    params['sepconv'] = dict(dw_w=nrm((cin, k)), dw_b=nrm((cin,)),
                             pw_w=nrm((cout, cin, 1)), pw_b=nrm((cout,)),
                             **bn(cout))

    combine_speaker_size = cout * 4
    params['blstmp3'] = lstm_proj(combine_speaker_size,
                                  configs['BLSTM_dim'],
                                  configs['BLSTM_Projection_dim'])

    params['FC'] = [dict(w=nrm((configs['output_dim'],
                                configs['BLSTM_Projection_dim'] * 2)),
                         b=nrm((configs['output_dim'],)))
                    for _ in range(configs['output_speaker'])]
    return params


# ----------------------------------------------------------------------------
# Full forward pass (mirrors TS_VAD_MC.forward)
# ----------------------------------------------------------------------------
def ts_vad_mc_forward(params, x, embedding, nframes, configs):
    B, Channel, Freq, Time = x.shape
    speaker = embedding.shape[1]
    emb_dim = configs['speaker_embedding_dim']
    A = configs['cnn_attention'][1]

    # ---- IDCT + BatchNorm2d(1) (eval) fused; bias is a length-Freq vector ----
    bn = params['batchnorm']
    s0 = bn['gamma'][0] / jnp.sqrt(bn['rv'][0] + _EPS)
    t0 = bn['beta'][0] - bn['rm'][0] * s0
    xt = x.transpose(0, 1, 3, 2).reshape(B * Channel * Time, Freq)
    x2 = matmul_bias(xt, (s0 * params['idct']).T, jnp.full((Freq,), t0))
    x_3 = x2.reshape(B * Channel, Time, Freq).transpose(0, 2, 1)    # (BC, F, T)

    # ---- average pooling (cmn branch) + combine ----
    x_3_mean = avg_pool1d(x_3, configs['average_pooling'])
    x_4 = jnp.concatenate([x_3, x_3_mean], axis=1).reshape(
        B * Channel, 2, Freq, Time)

    # ---- 4x Conv2d + BN + ReLU (NHWC inside, direct conv in-kernel) ----
    h = x_4.transpose(0, 2, 3, 1)                                   # (BC, F, T, 2)
    for cp in params['conv2d_sd']:
        h = conv2d_bn_relu_nhwc(h, cp)
    x_5 = h.transpose(0, 3, 1, 2)                                   # (BC, Cout, F, T)
    x_6 = x_5.reshape(B * Channel, -1, Time)
    Fp = x_6.shape[1]

    # ---- splice with speaker embeddings ----
    x_6_rep = jnp.broadcast_to(
        x_6[:, None, :, :], (B * Channel, speaker, Fp, Time)
    ).reshape(B * Channel * speaker, Fp, Time)
    emb_rep = jnp.broadcast_to(
        embedding[:, None, :, :], (B, Channel, speaker, emb_dim)
    ).reshape(B * Channel * speaker, emb_dim)
    emb_rep = jnp.broadcast_to(
        emb_rep[:, :, None], (B * Channel * speaker, emb_dim, Time))
    x_7 = jnp.concatenate([x_6_rep, emb_rep], axis=1)               # (BCS, Fp+E, T)

    # ---- Linear + ReLU ----
    x_8 = matmul_bias(
        x_7.transpose(0, 2, 1).reshape(-1, Fp + emb_dim),
        params['Linear']['w'].T, params['Linear']['b'], relu=True
    ).reshape(B * Channel * speaker, Time, -1)

    # ---- 2 shared BLSTM-Projection layers ----
    lens_eff = [n for n in nframes for _ in range(Channel) for _ in range(speaker)]
    x_9 = lstm_projection(x_8, lens_eff, params['blstmp1'])
    x_10 = lstm_projection(x_9, lens_eff, params['blstmp2'])

    # ---- SeparableConv1d attention: depthwise + pointwise + BN + ReLU ----
    sc = params['sepconv']
    dw = depthwise_conv1d(x_10, sc['dw_w'], sc['dw_b'])             # (BCS, T, Cin)
    s = sc['gamma'] / jnp.sqrt(sc['rv'] + _EPS)
    t = sc['beta'] - sc['rm'] * s
    pw_w = (sc['pw_w'][:, :, 0] * s[:, None]).T                     # (Cin, A)
    pw_b = sc['pw_b'] * s + t
    Cin_att = dw.shape[-1]
    x_11 = matmul_bias(dw.reshape(-1, Cin_att), pw_w, pw_b,
                       relu=True).reshape(B * Channel * speaker, Time, A)

    # ---- average over channels, combine speakers ----
    x_12 = jnp.mean(
        x_11.reshape(B, Channel, speaker, Time, A).transpose(0, 2, 3, 1, 4),
        axis=-2)                                                    # (B, S, T, A)
    x_13 = x_12.transpose(0, 2, 1, 3).reshape(B, Time, speaker * A)

    # ---- final BLSTM-Projection ----
    x_14 = lstm_projection(x_13, nframes, params['blstmp3'])

    # ---- gather valid frames; 4 FC heads fused into a single matmul ----
    lens_idx = np.array(
        [k for i, m in enumerate(nframes) for k in range(i * Time, m + i * Time)],
        dtype=np.int32)
    x_15 = x_14.reshape(B * Time, -1)[lens_idx, :]

    O = configs['output_dim']
    w_all = jnp.concatenate([fc['w'].T for fc in params['FC']], axis=1)
    b_all = jnp.concatenate([fc['b'] for fc in params['FC']])
    y_all = matmul_bias(x_15, w_all, b_all, relu=False)
    return [y_all[:, i * O:(i + 1) * O] for i in range(len(params['FC']))]


# ----------------------------------------------------------------------------
if __name__ == "__main__":
    configs = dict(
        input_dim=8,                  # Freq (MFCC dim)
        speaker_embedding_dim=8,
        Linear_dim=32,
        Shared_BLSTM_dim=16,
        Linear_Shared_layer1_dim=16,
        Linear_Shared_layer2_dim=16,
        cnn_attention=[32, 8, 3, 1],  # in, out, kernel, stride
        BLSTM_dim=16,
        BLSTM_Projection_dim=16,
        output_dim=2,
        output_speaker=4,
        average_pooling=3,
        cnn_configs=[[2, 8, 3, 1], [8, 8, 3, 1], [8, 8, 3, 1], [8, 8, 3, 1]],
        splice_size=8 * 8 + 8,        # last_conv_out * Freq + embedding_dim
    )
    assert configs['Linear_Shared_layer2_dim'] * 2 == configs['cnn_attention'][0]

    key = jax.random.PRNGKey(0)
    kp, kx, ke = jax.random.split(key, 3)
    params = init_params(kp, configs)

    B, Channel, Freq, Time = 2, 2, configs['input_dim'], 8
    x = jax.random.normal(kx, (B, Channel, Freq, Time), jnp.float32)
    embedding = jax.random.normal(
        ke, (B, configs['output_speaker'], configs['speaker_embedding_dim']),
        jnp.float32)
    nframes = [8, 6]                  # descending, max == Time

    outs = ts_vad_mc_forward(params, x, embedding, nframes, configs)
    for o in outs:
        jax.block_until_ready(o)
    assert len(outs) == configs['output_speaker']
    assert outs[0].shape == (sum(nframes), configs['output_dim'])
    print("KERNEL_OK")
</pallas_src>

<mosaic_0001>
module attributes {stable_mosaic.version = 11 : i64} {
  func.func @_mm_kernel(%arg0: i32, %arg1: memref<32x8xf32, #tpu.memory_space<vmem>>, %arg2: memref<8x8xf32, #tpu.memory_space<vmem>>, %arg3: memref<1x8xf32, #tpu.memory_space<vmem>>, %arg4: memref<32x8xf32, #tpu.memory_space<vmem>>) attributes {dimension_semantics = [#tpu.dimension_semantics<parallel>], iteration_bounds = array<i64: 1>, scalar_prefetch = 0 : i64, scratch_operands = 0 : i64, tpu.core_type = #tpu.core_type<tc>, window_params = [{transform_indices = @transform_0, window_bounds = array<i64: 32, 8>}, {pipeline_mode = #tpu.pipeline_mode<synchronous>, transform_indices = @transform_1, window_bounds = array<i64: 8, 8>}, {pipeline_mode = #tpu.pipeline_mode<synchronous>, transform_indices = @transform_2, window_bounds = array<i64: 1, 8>}, {transform_indices = @transform_3, window_bounds = array<i64: 32, 8>}]} {
    %c0 = arith.constant 0 : index
    %c0_0 = arith.constant 0 : index
    %0 = vector.load %arg1[%c0, %c0_0] : memref<32x8xf32, #tpu.memory_space<vmem>>, vector<32x8xf32>
    %c0_1 = arith.constant 0 : index
    %c0_2 = arith.constant 0 : index
    %1 = vector.load %arg2[%c0_1, %c0_2] : memref<8x8xf32, #tpu.memory_space<vmem>>, vector<8x8xf32>
    %cst = arith.constant dense<0.000000e+00> : vector<32x8xf32>
    %2 = tpu.matmul %0, %1, %cst {dimension_numbers = #tpu.dot_dimension_numbers<[1], [0], [0], [1], [0, 0, 1, 1], [], []>} : vector<32x8xf32>, vector<8x8xf32>, vector<32x8xf32> -> vector<32x8xf32>
    %c0_3 = arith.constant 0 : index
    %c0_4 = arith.constant 0 : index
    %3 = vector.load %arg3[%c0_3, %c0_4] : memref<1x8xf32, #tpu.memory_space<vmem>>, vector<1x8xf32>
    %4 = vector.broadcast %3 : vector<1x8xf32> to vector<32x8xf32>
    %5 = arith.addf %2, %4 : vector<32x8xf32>
    %c0_5 = arith.constant 0 : index
    %c0_6 = arith.constant 0 : index
    %6 = vector.load %arg4[%c0_5, %c0_6] : memref<32x8xf32, #tpu.memory_space<vmem>>, vector<32x8xf32>
    tpu.vector_store %arg4[%c0_5, %c0_6], %5 {strides = array<i32>} : memref<32x8xf32, #tpu.memory_space<vmem>>, vector<32x8xf32>,
    return
  }
  func.func @transform_0(%arg0: i32) -> (i32, i32) {
    %c0_i32 = arith.constant 0 : i32
    %c0_i32_0 = arith.constant 0 : i32
    return %arg0, %c0_i32 : i32, i32
  }
  func.func @transform_1(%arg0: i32) -> (i32, i32) {
    %c0_i32 = arith.constant 0 : i32
    %c0_i32_0 = arith.constant 0 : i32
    %c0_i32_1 = arith.constant 0 : i32
    return %c0_i32, %c0_i32_0 : i32, i32
  }
  func.func @transform_2(%arg0: i32) -> (i32, i32) {
    %c0_i32 = arith.constant 0 : i32
    %c0_i32_0 = arith.constant 0 : i32
    %c0_i32_1 = arith.constant 0 : i32
    return %c0_i32, %c0_i32_0 : i32, i32
  }
  func.func @transform_3(%arg0: i32) -> (i32, i32) {
    %c0_i32 = arith.constant 0 : i32
    %c0_i32_0 = arith.constant 0 : i32
    return %arg0, %c0_i32 : i32, i32
  }
}

</mosaic_0001>

<bundles_post_ra>
// kernel: tpu_custom_call.1
= control target key start
LH: loop header
LB: loop body
LE: loop exit
PB: predicated region body
PF: predicated region fallthrough
CT: control target
= control target key end

     0   :  { %vm26_vm0 = vcmask 64512   ;;  %s210_s1 = inlined_call_operand.vmem [shape: f32[8,8], index: 1, kind: input, shape index: {}]   ;;  %s211_s0 = inlined_call_operand.vmem [shape: f32[32,8], index: 0, kind: input, shape index: {}]   ;;  %s212_s2 = inlined_call_operand.vmem [shape: f32[1,8], index: 2, kind: input, shape index: {}]   ;;  %s213_s3 = inlined_call_operand.vmem [shape: f32[32,8], index: 3, kind: output, shape index: {}]  }
   0x1   :  { %v18_v0 = vld [vmem:[%s210_s1] sm:$0xff]  ;;  %v16_v2 = vld [vmem:[%s211_s0 + $0x10] sm:$0xff]  ;;  %v15_v3 = vld [vmem:[%s211_s0 + $0x8] sm:$0xff] }
   0x2   :  { %v14_v1 = vld [vmem:[%s211_s0] sm:$0xff]  ;;  %142 = vmatprep.subr.mxu0 %v18_v0  ;;  %150 = vmatprep.subr.mxu1 %v18_v0  ;;  %v17_v4 = vld [vmem:[%s211_s0 + $0x18] sm:$0xff] }
   0x3   :  { %143 = vmatpush3.msra.mxu0 %v18_v0  ;;  %151 = vmatpush3.msra.mxu1 %v18_v0  ;;  %v132_v5 = vld [vmem:[%s212_s2] ss:$0 sm:$0xff] }
   0x4   :  { %144 = vmatprep.mubr.msk.f32.mxu0 %vm26_vm0, %v14_v1  ;;  %147 = vmatprep.mubr.msk.f32.mxu1 %vm26_vm0, %v16_v2 }
   0x5   :  { %145 = vmatmul.mubr.msk.f32.vlgmr.msra.gmra.mxu0 %vm26_vm0, %v15_v3  ;;  %148 = vmatmul.mubr.msk.f32.vlgmr.msra.gmra.mxu1 %vm26_vm0, %v17_v4 }
  0xc5   :  { %v146_v6 = vpop.f32.mrf.mxu0  ;;  %v149_v7 = vpop.f32.mrf.mxu1 }
  0xc6   :  { %v111_v8 = vadd.f32 %v146_v6, %v132_v5  ;;  %v121_v9 = vadd.f32 %v149_v7, %v132_v5 }
  0xc7   :  { %v105_v10 = vpop.f32.mrf.mxu0  ;;  %v115_v11 = vpop.f32.mrf.mxu1 }
  0xc8   :  { %125 = vst.msk [vmem:[%s213_s3 + $0x8] sm:$0xff] %vm26_vm0, %v111_v8  ;;  %127 = vst.msk [vmem:[%s213_s3 + $0x18] sm:$0xff] %vm26_vm0, %v121_v9  ;;  %v106_v12 = vadd.f32 %v132_v5, %v105_v10  ;;  %v116_v13 = vadd.f32 %v132_v5, %v115_v11 }
  0xca   :  { %124 = vst.msk [vmem:[%s213_s3] sm:$0xff] %vm26_vm0, %v106_v12  ;;  %126 = vst.msk [vmem:[%s213_s3 + $0x10] sm:$0xff] %vm26_vm0, %v116_v13 }

</bundles_post_ra>
